<compile_context>
chip_gen: v5e
topology: v5e:2x2
jax: 0.10.0
libtpu: 0.0.40
codegen_flags: <defaults>
</compile_context>

<pallas_src>
import jax
import jax.numpy as jnp
from jax.experimental import pallas as pl
from jax.experimental.pallas import tpu as pltpu


def _cdiv(a, b):
    return -(-a // b)


def _round_up(a, b):
    return _cdiv(a, b) * b


def score_kernel(x_ref, embT_ref, bias_ref, out_ref):
    # x_ref:    (Bp, D)  bf16, grid-invariant (stays resident in VMEM)
    # embT_ref: (D, TE)  bf16 bn2-folded entity-table tile, streamed from HBM
    # bias_ref: (1, TE)  f32  bn2-shift bias row tile, streamed from HBM
    # out_ref:  (B, TE)  f32  double-sigmoid scores (last tile clipped to E by Pallas writeback)
    s = jnp.dot(x_ref[...], embT_ref[...], preferred_element_type=jnp.float32)
    s = s + bias_ref[...]                                   # broadcast (1, TE) over rows
    p = jax.nn.sigmoid(jax.nn.sigmoid(s))                   # faithful to module: RESCAL + forward()
    out_ref[...] = p[: out_ref.shape[0], :]                 # drop MXU sublane-padding rows


def prepare_tucker_rescal(ent_emb, rel_emb, bn0_params, bn2_params, *,
                          tile_e_cap=4096, eps=1e-5):
    """One-time (per eval model) preparation: BN folding, bn2-folded entity table transpose +
    bf16 cast, bias row, bf16 relation table, tile-width / grid derivation.  Cache across calls."""
    E, D = ent_emb.shape
    ent_emb = ent_emb.astype(jnp.float32)

    def fold_bn(p):
        scale = p['weight'] / jnp.sqrt(p['running_var'] + eps)
        shift = p['bias'] - p['running_mean'] * scale
        return scale.astype(jnp.float32), shift.astype(jnp.float32)

    bn0_scale, bn0_shift = fold_bn(bn0_params)
    bn2_scale, bn2_shift = fold_bn(bn2_params)

    # --- entity tile width from a target EVEN grid count (v7x megacore balance),
    #     lane-aligned, padding kept below ~grid*128 columns (vs. fixed te=2048). ---
    g = max(2, _cdiv(E, int(tile_e_cap)))
    if g % 2:
        g += 1
    te = _round_up(_cdiv(E, g), 128)
    te = min(te, _round_up(E, 128))          # never wider than the (lane-aligned) table
    grid = _cdiv(E, te)                       # == g except for tiny E (then 1)
    E_pad = grid * te

    # --- fold bn2 into the entity table in f32, then cast; precompute the bias row ---
    embT = bn2_scale[:, None] * ent_emb.T                    # (D, E) f32
    bias_e = (bn2_shift @ ent_emb.T)[None, :]                # (1, E) f32
    if E_pad != E:
        embT = jnp.pad(embT, ((0, 0), (0, E_pad - E)))
        bias_e = jnp.pad(bias_e, ((0, 0), (0, E_pad - E)))
    embT = embT.astype(jnp.bfloat16)

    return dict(ent_emb=ent_emb, embT=embT, bias_e=bias_e,
                rel_emb=rel_emb.astype(jnp.bfloat16),
                bn0_scale=bn0_scale, bn0_shift=bn0_shift,
                D=D, E=E, E_pad=E_pad, tile_e=te, grid=grid)


def tucker_rescal_forward(e1_idx, r_idx, prepared):
    D, E = prepared['D'], prepared['E']
    te, grid = prepared['tile_e'], prepared['grid']
    embT, bias_e = prepared['embT'], prepared['bias_e']

    # ---- grid-invariant glue (only B x D / B x D x D work): gather, folded bn0, batched bmm ----
    # NOTE: batching many (e1, r) queries per call amortizes the entity-table stream; the kernel
    # supports any B (rows are sublane-padded for the MXU and sliced back inside the kernel).
    head = prepared['ent_emb'][e1_idx]                                   # (B, D) f32
    B = head.shape[0]
    h = head * prepared['bn0_scale'] + prepared['bn0_shift']             # bn0 (eval, folded, f32)
    rel = prepared['rel_emb'][r_idx].reshape(B, D, D)                    # bf16 relation gather
    x = jnp.einsum('bd,bde->be', h.astype(jnp.bfloat16), rel,
                   preferred_element_type=jnp.float32)                   # bmm -> (B, D) f32
    # bn2 is already folded into embT / bias_e (done in f32 at prepare time).

    Bp = max(8, _round_up(B, 8))      # full sublanes for the MXU LHS
    if Bp != B:
        x = jnp.pad(x, ((0, Bp - B), (0, 0)))
    x = x.astype(jnp.bfloat16)

    # ---- VMEM budget: double-buffered embT/bias/out tiles + resident x, plus headroom ----
    B8 = _round_up(B, 8)
    need = (2 * D * te * 2          # embT tile, double-buffered, bf16
            + 2 * 8 * te * 4        # bias tile, double-buffered, f32 (1 row -> 8 sublanes)
            + 2 * B8 * te * 4       # out tile, double-buffered, f32
            + Bp * D * 2)           # resident x, bf16
    try:
        cap = int(pltpu.get_tpu_info().vmem_capacity_bytes)              # generation-aware
    except Exception:
        cap = 64 << 20                                                   # v7x worst case
    vmem_limit = int(min(max(need + (8 << 20), 16 << 20), cap))

    out = pl.pallas_call(
        score_kernel,
        out_shape=jax.ShapeDtypeStruct((B, E), jnp.float32),
        grid_spec=pltpu.PrefetchScalarGridSpec(
            num_scalar_prefetch=0,
            grid=(grid,),
            in_specs=[
                pl.BlockSpec((Bp, D), lambda j: (0, 0)),     # x: grid-invariant, resident
                pl.BlockSpec((D, te), lambda j: (0, j)),     # bn2-folded entity table tile
                pl.BlockSpec((1, te), lambda j: (0, j)),     # bn2-shift bias tile
            ],
            out_specs=pl.BlockSpec((B, te), lambda j: (0, j)),
        ),
        compiler_params=pltpu.CompilerParams(
            dimension_semantics=("parallel",),               # megacore-shard the entity axis
            vmem_limit_bytes=vmem_limit),
    )(x, embT, bias_e)

    return out                                               # exactly (B, E): no post-kernel slice


def reference_forward(e1_idx, r_idx, ent_emb, rel_emb, bn0_params, bn2_params, eps=1e-5):
    head = ent_emb[e1_idx]
    rel = rel_emb[r_idx]
    B, D = head.shape

    def bn(v, p):
        return (v - p['running_mean']) / jnp.sqrt(p['running_var'] + eps) \
            * p['weight'] + p['bias']

    h = bn(head, bn0_params)
    x = jnp.einsum('bd,bde->be', h, rel.reshape(B, D, D))
    x = bn(x, bn2_params)
    s = x @ ent_emb.T
    return jax.nn.sigmoid(jax.nn.sigmoid(s))


if __name__ == "__main__":
    # small deterministic synthetic setup consistent with the module:
    # entity dim D, relation dim D*D (RESCAL), E entities (not a multiple of 128, to exercise
    # the clipped last output tile), R relations.
    B, D, E, R = 2, 32, 300, 8

    key = jax.random.PRNGKey(0)
    k_ent, k_rel, k0w, k0b, k0m, k0v, k2w, k2b, k2m, k2v = jax.random.split(key, 10)

    ent_emb = jax.random.normal(k_ent, (E, D), dtype=jnp.float32) * 0.1
    rel_emb = jax.random.normal(k_rel, (R, D * D), dtype=jnp.float32) * 0.1

    bn0_params = {
        'weight': jax.random.uniform(k0w, (D,), minval=0.5, maxval=1.5, dtype=jnp.float32),
        'bias': jax.random.normal(k0b, (D,), dtype=jnp.float32) * 0.1,
        'running_mean': jax.random.normal(k0m, (D,), dtype=jnp.float32) * 0.05,
        'running_var': jax.random.uniform(k0v, (D,), minval=0.5, maxval=1.5, dtype=jnp.float32),
    }
    bn2_params = {
        'weight': jax.random.uniform(k2w, (D,), minval=0.5, maxval=1.5, dtype=jnp.float32),
        'bias': jax.random.normal(k2b, (D,), dtype=jnp.float32) * 0.1,
        'running_mean': jax.random.normal(k2m, (D,), dtype=jnp.float32) * 0.05,
        'running_var': jax.random.uniform(k2v, (D,), minval=0.5, maxval=1.5, dtype=jnp.float32),
    }

    e1_idx = jnp.array([3, 100], dtype=jnp.int32)
    r_idx = jnp.array([1, 5], dtype=jnp.int32)

    prepared = prepare_tucker_rescal(ent_emb, rel_emb, bn0_params, bn2_params)  # cached
    pred = tucker_rescal_forward(e1_idx, r_idx, prepared)
    pred = jax.block_until_ready(pred)

    ref = reference_forward(e1_idx, r_idx, ent_emb, rel_emb, bn0_params, bn2_params)
    assert pred.shape == (B, E)
    # bf16 relation / x / entity-table stream -> relaxed tolerance (double sigmoid attenuates it)
    assert jnp.allclose(pred, ref, atol=2e-3, rtol=0), "mismatch vs pure-JAX reference"

    print("KERNEL_OK")
</pallas_src>

<mosaic_0001>
module attributes {stable_mosaic.version = 11 : i64} {
  func.func @score_kernel(%arg0: i32, %arg1: memref<8x32xbf16, #tpu.memory_space<vmem>>, %arg2: memref<32x256xbf16, #tpu.memory_space<vmem>>, %arg3: memref<1x256xf32, #tpu.memory_space<vmem>>, %arg4: memref<2x256xf32, #tpu.memory_space<vmem>>) attributes {dimension_semantics = [#tpu.dimension_semantics<parallel>], iteration_bounds = array<i64: 2>, scalar_prefetch = 0 : i64, scratch_operands = 0 : i64, tpu.core_type = #tpu.core_type<tc>, window_params = [{pipeline_mode = #tpu.pipeline_mode<synchronous>, transform_indices = @transform_0, window_bounds = array<i64: 8, 32>}, {transform_indices = @transform_1, window_bounds = array<i64: 32, 256>}, {transform_indices = @transform_2, window_bounds = array<i64: 1, 256>}, {transform_indices = @transform_3, window_bounds = array<i64: 2, 256>}]} {
    %c0 = arith.constant 0 : index
    %c0_0 = arith.constant 0 : index
    %0 = vector.load %arg1[%c0, %c0_0] : memref<8x32xbf16, #tpu.memory_space<vmem>>, vector<8x32xbf16>
    %c0_1 = arith.constant 0 : index
    %c0_2 = arith.constant 0 : index
    %1 = vector.load %arg2[%c0_1, %c0_2] : memref<32x256xbf16, #tpu.memory_space<vmem>>, vector<32x256xbf16>
    %cst = arith.constant dense<0.000000e+00> : vector<8x256xf32>
    %2 = tpu.matmul %0, %1, %cst {dimension_numbers = #tpu.dot_dimension_numbers<[1], [0], [0], [1], [0, 0, 1, 1], [], []>} : vector<8x32xbf16>, vector<32x256xbf16>, vector<8x256xf32> -> vector<8x256xf32>
    %c0_3 = arith.constant 0 : index
    %c0_4 = arith.constant 0 : index
    %3 = vector.load %arg3[%c0_3, %c0_4] : memref<1x256xf32, #tpu.memory_space<vmem>>, vector<1x256xf32>
    %4 = vector.broadcast %3 : vector<1x256xf32> to vector<8x256xf32>
    %5 = arith.addf %2, %4 : vector<8x256xf32>
    %6 = arith.negf %5 : vector<8x256xf32>
    %7 = math.exp %6 : vector<8x256xf32>
    %cst_5 = arith.constant 1.000000e+00 : f32
    %8 = vector.broadcast %cst_5 : f32 to vector<8x256xf32>
    %9 = arith.addf %8, %7 : vector<8x256xf32>
    %10 = arith.divf %8, %9 : vector<8x256xf32>
    %11 = arith.negf %10 : vector<8x256xf32>
    %12 = math.exp %11 : vector<8x256xf32>
    %cst_6 = arith.constant 1.000000e+00 : f32
    %13 = vector.broadcast %cst_6 : f32 to vector<8x256xf32>
    %14 = arith.addf %13, %12 : vector<8x256xf32>
    %15 = arith.divf %13, %14 : vector<8x256xf32>
    %16 = vector.extract_strided_slice %15 {offsets = [0, 0], sizes = [2, 256], strides = [1, 1]} : vector<8x256xf32> to vector<2x256xf32>
    %c0_7 = arith.constant 0 : index
    %c0_8 = arith.constant 0 : index
    %17 = vector.load %arg4[%c0_7, %c0_8] : memref<2x256xf32, #tpu.memory_space<vmem>>, vector<2x256xf32>
    tpu.vector_store %arg4[%c0_7, %c0_8], %16 {strides = array<i32>} : memref<2x256xf32, #tpu.memory_space<vmem>>, vector<2x256xf32>,
    return
  }
  func.func @transform_0(%arg0: i32) -> (i32, i32) {
    %c0_i32 = arith.constant 0 : i32
    %c0_i32_0 = arith.constant 0 : i32
    %c0_i32_1 = arith.constant 0 : i32
    return %c0_i32, %c0_i32_0 : i32, i32
  }
  func.func @transform_1(%arg0: i32) -> (i32, i32) {
    %c0_i32 = arith.constant 0 : i32
    %c0_i32_0 = arith.constant 0 : i32
    return %c0_i32, %arg0 : i32, i32
  }
  func.func @transform_2(%arg0: i32) -> (i32, i32) {
    %c0_i32 = arith.constant 0 : i32
    %c0_i32_0 = arith.constant 0 : i32
    return %c0_i32, %arg0 : i32, i32
  }
  func.func @transform_3(%arg0: i32) -> (i32, i32) {
    %c0_i32 = arith.constant 0 : i32
    %c0_i32_0 = arith.constant 0 : i32
    return %c0_i32, %arg0 : i32, i32
  }
}

</mosaic_0001>

<bundles_post_ra>
// kernel: tpu_custom_call.1
= control target key start
LH: loop header
LB: loop body
LE: loop exit
PB: predicated region body
PF: predicated region fallthrough
CT: control target
= control target key end

     0   :  { %s1049_s0 = inlined_call_operand.hbm [shape: bf16[8,32], index: 0, kind: input, shape index: {}]   ;;  %s1050_s1 = inlined_call_operand.hbm [shape: bf16[32,512], index: 1, kind: input, shape index: {}]   ;;  %s1051_s2 = inlined_call_operand.hbm [shape: f32[1,512], index: 2, kind: input, shape index: {}]   ;;  %s1052_s3 = inlined_call_operand.hbm [shape: f32[2,300], index: 3, kind: output, shape index: {}]  }
   0x1   :  { %1053 = sst [smem:[#allocation12_spill]] %s1049_s0 }
   0x2   :  { %8 = vsyncpa [#allocation3], 0 }
   0x3   :  { %9 = vsyncpa [#allocation6], 0 }
   0x4   :  { %11 = vsyncpa [#allocation6 + $0x1], 0 }
   0x5   :  { %12 = vsyncpa [#allocation4], 0 }
   0x6   :  { %14 = vsyncpa [#allocation4 + $0x1], 0  ;;  %s849_s12 = smov 0   ;;  %s851_s13 = smov 0  }
   0x7   :  { %s853_s14 = smov 0   ;;  %s855_s15 = smov 0  }
   0x8 LB: > { %s870_s16 = sadd.s32 1, %s822_s15   ;;  %s48_s17 = sadd.s32 1, %s818_s14  ;;  %s822_s15 = sphi %s855_s15, %s1067_s15   ;;  %s818_s14 = sphi %s853_s14, %s1066_s14   ;;  %s814_s13 = sphi %s851_s13, %s1065_s13   ;;  %s810_s12 = sphi %s849_s12, %s1064_s12  }
   0x9   : > { %s45_s18 = ssub.s32 %s822_s15, %s870_s16  ;;  %p55_p0 = scmp.ne.s32.totalorder %s818_s14, %s814_s13 }
   0xa   : > { %p46_p1 = scmp.eq.s32.totalorder %s45_s18, 0  ;;  %p56_p2 = scmp.eq.s32.totalorder %s822_s15, 0 }
   0xb   : > { %p596_p4 = scmp.lt.s32.totalorder %s822_s15, 2  ;;  %s149_s20 = sand.u32 1, %s822_s15  }
   0xc   : > { %s881_s19 = scalar_select %p46_p1, %s818_s14, %s48_s17  }
   0xd   : > { %p57_p5 = por %p56_p2, %p55_p0  ;;  %s151_s21 = sand.u32 1, %s818_s14  }
   0xe   : > { %s524_s22 = sshll.u32 %s151_s21, 5  ;;  %s565_s23 = sshll.u32 %s822_s15, 3 }
   0xf   : > { %s158_s26 = scalar_lea.hbm %s1050_s1, %s565_s23  ;;  %s153_s28 = scalar_lea.vmem [#allocation5], %s524_s22 }
  0x10   : > { %s159_s27 = sshll.u32 %s158_s26, 4  ;;  %s161_s29 = sshll.u32 %s153_s28, 4  ;;  %s160_s27 = int_to_ptr.hbm [resolvable:$true] %s159_s27  ;;  %s162_s29 = int_to_ptr.vmem [resolvable:$true] %s161_s29 }
  0x11   : > { %p896_p6 = pnand %p596_p4, %p57_p5  ;;  %s900_s4 = scalar_lea.sflag [#allocation6], %s149_s20 }
  0x12   : > { %s651_s5 = sshra.s32 %s160_s27, 4  ;;  %s658_s9 = scalar_lea.hbm %s1050_s1, 64  ;;  %s652_s5 = int_to_ptr.hbm [resolvable:$true] %s651_s5 }
  0x13   : > { %s653_s6 = scalar_lea.hbm %s652_s5, 32  ;;  %p655_p8 = pneg %p896_p6 }
  0x14   : > { %p654_p7 = scmp.ne.s32.totalorder %s652_s5, %s653_s6  ;;  %p659_p11 = scmp.lt.s32.totalorder %s652_s5, %s1050_s1 }
  0x15   : > { %p660_p12 = scmp.lt.s32.totalorder %s658_s9, %s653_s6 }
  0x16   : > { %p656_p9 = pnand %p655_p8, %p654_p7 }
  0x17   : > { %p661_p13 = por %p660_p12, %p659_p11 }
  0x18   : > { %p657_p10 = pneg %p656_p9 }
  0x1a   : > { %p662_p1 = pnand %p661_p13, %p657_p10 }
  0x1c   : > { %665 = shalt.err (!%p662_p1)
}
  0x1d   : > { %s824_s17 = smov 256   ;;  %s825_s18 = smov 128  }
  0x1e   : > { %s826_s20 = smov 8   ;;  %s917_s22 = sadd.s32 4294967295, %s822_s15  }
  0x1f   : > { %587 = dma.hbm_to_vmem [thread:$0]  (!%p896_p6), %s160_s27, 512, %s162_s29, %s900_s4, %s824_s17, %s825_s18, %s826_s20  }
  0x20   : > { %s520_s23 = sadd.s32 4294967294, %s822_s15   ;;  %p61_p2 = scmp.ne.s32.totalorder %s814_s13, %s810_s12 }
  0x21   : > { %p62_p4 = scmp.eq.s32.totalorder %s917_s22, 0  ;;  %p111_p5 = scmp.eq.s32.totalorder %s917_s22, 1 }
  0x22   : > { %p117_p7 = scmp.eq.s32.totalorder %s520_s23, 1  ;;  %p521_p9 = scmp.ge.s32.totalorder %s822_s15, 1 }
  0x23   : > { %p927_p10 = por %p62_p4, %p61_p2  ;;  %p934_p11 = por %p111_p5, %p55_p0 }
  0x24   : > { %p938_p12 = por %p117_p7, %p61_p2  ;;  %p124_p13 = scmp.lt.s32.totalorder %s822_s15, 3 }
  0x25   : > { %s1058_s0 = sld [smem:[#allocation12_spill]]  ;;  %s527_s6 = sshll.u32 %s151_s21, 1 }
  0x26   : > { %p946_p1 = pnand %p521_p9, %p124_p13  ;;  %s827_s7 = smov [#allocation2]  }
  0x27   : > { %s138_s8 = sshll.u32 %s827_s7, 4  ;;  %s528_s9 = sshll.u32 %s822_s15, 1  ;;  %s139_s8 = int_to_ptr.vmem [resolvable:$true] %s138_s8 }
  0x28   : > { %p580_p0 = pneg %p946_p1  ;;  %s179_s17 = scalar_lea.hbm %s1051_s2, %s528_s9 }
  0x29   : > { %s175_s18 = scalar_lea.vmem [#allocation7], %s527_s6  ;;  %s181_s23 = sshll.u32 %s179_s17, 4  ;;  %s182_s23 = int_to_ptr.hbm [resolvable:$true] %s181_s23 }
  0x2a   : > { %p581_p2 = pnand %p580_p0, %p62_p4  ;;  %s183_s20 = sshll.u32 %s175_s18, 4  ;;  %s184_s20 = int_to_ptr.vmem [resolvable:$true] %s183_s20 }
  0x2b   : > { %s136_s29 = sshll.u32 %s1058_s0, 4  ;;  %s711_s21 = sshra.s32 %s182_s23, 4  ;;  %s137_s29 = int_to_ptr.hbm [resolvable:$true] %s136_s29  ;;  %s712_s21 = int_to_ptr.hbm [resolvable:$true] %s711_s21 }
  0x2c   : > { %583 = dma.hbm_to_vmem [thread:$0]  (!%p581_p2), %s137_s29, 64, %s139_s8, [#allocation3]  }
  0x2d   : > { %s713_s27 = scalar_lea.hbm %s712_s21, 2  ;;  %s718_s0 = scalar_lea.hbm %s1051_s2, 4 }
  0x2e   : > { %p714_p5 = scmp.ne.s32.totalorder %s712_s21, %s713_s27  ;;  %p719_p13 = scmp.lt.s32.totalorder %s712_s21, %s1051_s2 }
  0x2f   : > { %p720_p0 = scmp.lt.s32.totalorder %s718_s0, %s713_s27 }
  0x30   : > { %p716_p7 = pnand %p714_p5, %p655_p8 }
  0x31   : > { %p721_p2 = por %p720_p0, %p719_p13 }
  0x32   : > { %p717_p9 = pneg %p716_p7 }
  0x34   : > { %p722_p3 = pnand %p721_p2, %p717_p9 }
  0x36   : > { %725 = shalt.err (!%p722_p3)
}
  0x37   : > { %590 = dma.hbm_to_vmem [thread:$0]  (!%p896_p6), %s182_s23, 32, %s184_s20, %s900_s4  }
  0x38   : > { %192 = sbr.rel (%p946_p1) target bundleno = 295 (0x127), region = 32 }
  0x3d   : > { %797 = dma.done.wait (%p62_p4), [#allocation3], 64  }
  0x3e   : > { %799 = vsyncadd (%p62_p4), [#allocation3], 4294967232  ;;  %s199_s0 = sand.u32 1, %s917_s22   ;;  %s980_s29 = sand.u32 1, %s814_s13  }
  0x3f   : > { %s531_s6 = sshll.u32 %s980_s29, 5  ;;  %s200_s30 = scalar_lea.sflag [#allocation6], %s199_s0 }
  0x40   : > { %s203_s8 = scalar_lea.vmem [#allocation5], %s531_s6 }
  0x41   : > { %801 = dma.done.wait (%p927_p10), %s200_s30, 544  }
  0x42   : > { %803 = vsyncadd (%p927_p10), %s200_s30, 4294966752  ;;  %v544_v0 = vld [vmem:[%s203_s8 + $0x10] sm:$0xf]  ;;  %v569_v1 = vld [vmem:[%s203_s8 + $0x14] sm:$0xf0]  ;;  %vm281_vm0 = vcmask 261120  }
  0x43   : > { %v568_v2 = vld [vmem:[%s203_s8 + $0x14] sm:$0xf]  ;;  %v545_v3 = vor.u32 %v569_v1, %v544_v0  ;;  %v546_v4 = vld [vmem:[%s203_s8 + $0x18] sm:$0xf0]  ;;  %v536_v5 = vld [vmem:[%s203_s8] sm:$0xf] }
  0x44   : > { %v567_v6 = vld [vmem:[%s203_s8 + $0x4] sm:$0xf0]  ;;  %v549_v7 = vor.u32 %v568_v2, %v546_v4  ;;  %v566_v8 = vld [vmem:[%s203_s8 + $0x4] sm:$0xf]  ;;  %v538_v9 = vld [vmem:[%s203_s8 + $0x8] sm:$0xf0] }
  0x45   : > { %291 = vmatpush.bf16.msra.mxu0 %v545_v3  ;;  %v537_v10 = vor.u32 %v567_v6, %v536_v5  ;;  %v541_v11 = vor.u32 %v566_v8, %v538_v9  ;;  %v250_v12 = vld [vmem:[#allocation2] sm:$0xf]  ;;  %s532_s4 = sshll.u32 %s980_s29, 1  ;;  %s533_s5 = sshll.u32 %s980_s29, 2 }
  0x46   : > { %304 = vmatpush.bf16.msra.mxu1 %v549_v7  ;;  %s213_s24 = scalar_lea.vmem [#allocation7], %s532_s4  ;;  %s241_s11 = scalar_lea.vmem [#allocation8], %s533_s5 }
  0x47   : > { %v255_v13 = vld [vmem:[%s213_s24] sm:$0x3]  ;;  %s395_s17 = scalar_lea.sflag [#allocation4], %s980_s29  ;;  %s557_s18 = sshll.u32 (%p934_p11), %s917_s22, 1 }
  0x48   : > { %v257_v14 = vperm.slane %v255_v13, 0  ;;  %v258_v15 = vperm.slane %v255_v13, 1  ;;  %s403_s20 = ssub.s32 (%p934_p11), 3, %s557_s18 }
  0x49   : > { %292 = vmatpush.bf16.msra.mxu0 %v537_v10  ;;  %p404_p3 = scmp.lt.s32.totalorder (%p934_p11), %s403_s20, 2 }
  0x4a   : > { %305 = vmatpush.bf16.msra.mxu1 %v541_v11 }
  0x4c   : > { %550 = vmatmul.msk.bf16.vlgmr.msra.gmra.mxu0 %vm281_vm0, %v250_v12 }
  0x4d   : > { %551 = vmatmul.msk.bf16.vlgmr.msra.gmra.mxu1 %vm281_vm0, %v250_v12  ;;  %vm390_vm0 = vcmask 1041408  }
  0xc9   : > { %v294_v16 = vpop.f32.mrf.mxu0 }
  0xca   : > { %v295_v17 = vadd.f32 %v294_v16, %v257_v14  ;;  %v307_v18 = vpop.f32.mrf.mxu1 }
  0xcb   : > { %v308_v19 = vadd.f32 %v307_v18, %v258_v15 }
  0xcc   : > { %v552_v20 = vmul.f32 -1.442695, %v295_v17 }
  0xcd   : > { %v553_v21 = vmul.f32 -1.442695, %v308_v19 }
  0xce   : > { %635 = vpow2.f32 %v552_v20 }
  0xcf   : > { %637 = vpow2.f32 %v553_v21 }
  0xd1   : > { %v296_v22 = vpop.f32.mrf.mxu0 }
  0xd2   : > { %v309_v23 = vpop.f32.mrf.mxu1 }
  0xd4   : > { %v636_v24 = vpop.eup %635 }
  0xd5   : > { %v638_v25 = vpop.eup %637  ;;  %v317_v26 = vadd.f32 1.0, %v636_v24 }
  0xd6   : > { %v318_v27 = vadd.f32 1.0, %v638_v25 }
  0xd7   : > { %639 = vrcp.f32 %v317_v26  ;;  %v330_v33 = vand.u32 2147483648, %v317_v26  ;;  %v328_v36 = vand.u32 2147483647, %v317_v26  ;;  %vm324_vm3 = vweird.f32 %v317_v26 }
  0xd8   : > { %641 = vrcp.f32 %v318_v27  ;;  %v345_v37 = vand.u32 2147483648, %v318_v27  ;;  %v343_v39 = vand.u32 2147483647, %v318_v27  ;;  %vm339_vm5 = vweird.f32 %v318_v27 }
  0xd9   : > { %v331_v41 = vor.u32 1.1754944e-38, %v330_v33  ;;  %vm329_vm6 = vcmp.eq.f32.partialorder %v328_v36, 8.507059e+37 }
  0xda   : > { %v346_v44 = vor.u32 1.1754944e-38, %v345_v37  ;;  %vm344_vm8 = vcmp.eq.f32.partialorder %v343_v39, 8.507059e+37 }
  0xdd   : > { %v640_v28 = vpop.eup %639 }
  0xde   : > { %v642_v29 = vpop.eup %641  ;;  %v320_v30 = vmul.f32 %v640_v28, %v317_v26  ;;  %vm325_vm1 = vweird.f32 %v640_v28 }
  0xdf   : > { %v335_v31 = vmul.f32 %v642_v29, %v318_v27  ;;  %vm340_vm2 = vweird.f32 %v642_v29  ;;  %vm326_vm4 = vmor %vm324_vm3, %vm325_vm1 }
  0xe0   : > { %v321_v32 = vsub.f32 1.0, %v320_v30  ;;  %vm341_vm7 = vmor %vm339_vm5, %vm340_vm2 }
  0xe1   : > { %v336_v34 = vsub.f32 1.0, %v335_v31 }
  0xe2   : > { %v322_v35 = vmul.f32 %v640_v28, %v321_v32 }
  0xe3   : > { %v337_v38 = vmul.f32 %v642_v29, %v336_v34 }
  0xe4   : > { %v323_v40 = vadd.f32 %v640_v28, %v322_v35 }
  0xe5   : > { %v338_v42 = vadd.f32 %v642_v29, %v337_v38 }
  0xe6   : > { %v327_v43 = vsel %vm326_vm4, %v640_v28, %v323_v40 }
  0xe7   : > { %v332_v45 = vsel %vm329_vm6, %v331_v41, %v327_v43  ;;  %v342_v46 = vsel %vm341_vm7, %v642_v29, %v338_v42 }
  0xe8   : > { %v554_v47 = vmul.f32 -1.442695, %v332_v45  ;;  %v347_v48 = vsel %vm344_vm8, %v346_v44, %v342_v46 }
  0xe9   : > { %v555_v49 = vmul.f32 -1.442695, %v347_v48 }
  0xea   : > { %643 = vpow2.f32 %v554_v47 }
  0xeb   : > { %645 = vpow2.f32 %v555_v49 }
  0xf0   : > { %v644_v50 = vpop.eup %643 }
  0xf1   : > { %v646_v51 = vpop.eup %645  ;;  %v355_v52 = vadd.f32 1.0, %v644_v50 }
  0xf2   : > { %v356_v53 = vadd.f32 1.0, %v646_v51 }
  0xf3   : > { %647 = vrcp.f32 %v355_v52  ;;  %vm362_vm11 = vweird.f32 %v355_v52  ;;  %v368_v1 = vand.u32 2147483648, %v355_v52  ;;  %v366_v3 = vand.u32 2147483647, %v355_v52 }
  0xf4   : > { %649 = vrcp.f32 %v356_v53  ;;  %v383_v61 = vand.u32 2147483648, %v356_v53  ;;  %v381_v63 = vand.u32 2147483647, %v356_v53  ;;  %vm377_vm13 = vweird.f32 %v356_v53 }
  0xf5   : > { %v369_v8 = vor.u32 1.1754944e-38, %v368_v1  ;;  %vm367_vm1 = vcmp.eq.f32.partialorder %v366_v3, 8.507059e+37 }
  0xf6   : > { %v384_v5 = vor.u32 1.1754944e-38, %v383_v61  ;;  %vm382_vm15 = vcmp.eq.f32.partialorder %v381_v63, 8.507059e+37 }
  0xf9   : > { %v648_v54 = vpop.eup %647 }
  0xfa   : > { %v650_v55 = vpop.eup %649  ;;  %v358_v56 = vmul.f32 %v648_v54, %v355_v52  ;;  %vm363_vm9 = vweird.f32 %v648_v54 }
  0xfb   : > { %v373_v57 = vmul.f32 %v650_v55, %v356_v53  ;;  %vm378_vm10 = vweird.f32 %v650_v55  ;;  %vm988_vm12 = vmor %vm362_vm11, %vm363_vm9 }
  0xfc   : > { %v359_v58 = vsub.f32 1.0, %v358_v56  ;;  %vm379_vm14 = vmor %vm377_vm13, %vm378_vm10 }
  0xfd   : > { %v374_v59 = vsub.f32 1.0, %v373_v57 }
  0xfe   : > { %v360_v60 = vmul.f32 %v648_v54, %v359_v58 }
  0xff   : > { %v375_v62 = vmul.f32 %v650_v55, %v374_v59 }
 0x100   : > { %v361_v0 = vadd.f32 %v648_v54, %v360_v60 }
 0x101   : > { %v376_v4 = vadd.f32 %v650_v55, %v375_v62 }
 0x102   : > { %v365_v6 = vsel %vm988_vm12, %v648_v54, %v361_v0 }
 0x103   : > { %v380_v7 = vsel %vm379_vm14, %v650_v55, %v376_v4  ;;  %v370_v11 = vsel %vm367_vm1, %v369_v8, %v365_v6 }
 0x104   : > { %v385_v9 = vsel %vm382_vm15, %v384_v5, %v380_v7  ;;  %401 = sbr.rel (!%p934_p11) target bundleno = 295 (0x127), region = 48 }
 0x105   : > { %v389_v10 = vrot.slane %v385_v9, 6 }
 0x107   : > { %v391_v12 = vsel %vm390_vm0, %v370_v11, %v389_v10 }
 0x108   : > { %393 = vst [vmem:[%s241_s11] sm:$0xf] %v391_v12 }
 0x109   : > { %s1069_s20 = smov (!%p404_p3, %s403_s20), 2 }
 0x10a   : > { %s558_s23 = sshll.u32 %s1069_s20, 1 }
 0x10b   : > { %s407_s21 = ssub.s32 4, %s558_s23 }
 0x10c   : > { %s408_s27 = sshll.u32 %s407_s21, 4 }
 0x10d   : > { %409 = vsyncadd %s395_s17, %s408_s27  ;;  %p1004_p6 = scmp.ne.s32.totalorder %s558_s23, 0  ;;  %s570_s25 = sshll.u32 %s917_s22, 2 }
 0x10e   : > { %s412_s9 = scalar_lea.hbm %s1052_s3, %s570_s25  ;;  %s562_s0 = sshll.u32 %s1069_s20, 5 }
 0x10f   : > { %s415_s6 = sshll.u32 %s241_s11, 4  ;;  %s417_s30 = sshll.u32 %s412_s9, 4  ;;  %s416_s6 = int_to_ptr.vmem [resolvable:$true] %s415_s6  ;;  %s418_s30 = int_to_ptr.hbm [resolvable:$true] %s417_s30 }
 0x110   : > { %s741_s8 = sshra.s32 %s416_s6, 4  ;;  %s743_s4 = sshrl.u32 %s562_s0, 4  ;;  %s742_s8 = int_to_ptr.vmem [resolvable:$true] %s741_s8 }
 0x111   : > { %s748_s24 = scalar_lea.vmem %s742_s8, %s743_s4  ;;  %s828_s5 = smov [#allocation8]  }
 0x112   : > { %p749_p8 = scmp.ne.s32.totalorder %s742_s8, %s748_s24  ;;  %s752_s22 = scalar_lea.vmem %s828_s5, 8 }
 0x113   : > { %p754_p11 = scmp.lt.s32.totalorder %s752_s22, %s748_s24 }
 0x114   : > { %p750_p4 = pnand %p749_p8, %p1004_p6 }
 0x116   : > { %p751_p10 = pneg %p750_p4 }
 0x118   : > { %p756_p1 = pnand %p754_p11, %p751_p10 }
 0x11a   : > { %759 = shalt.err (!%p756_p1)
}
 0x11b   : > { %s760_s18 = sshra.s32 %s418_s30, 4  ;;  %s771_s27 = scalar_lea.hbm %s1052_s3, 6  ;;  %s761_s18 = int_to_ptr.hbm [resolvable:$true] %s760_s18 }
 0x11c   : > { %s767_s11 = scalar_lea.hbm %s761_s18, %s743_s4  ;;  %p772_p13 = scmp.lt.s32.totalorder %s761_s18, %s1052_s3 }
 0x11d   : > { %p768_p5 = scmp.ne.s32.totalorder %s761_s18, %s767_s11  ;;  %p773_p0 = scmp.lt.s32.totalorder %s771_s27, %s767_s11 }
 0x11f   : > { %p769_p7 = pnand %p768_p5, %p1004_p6  ;;  %p774_p2 = por %p773_p0, %p772_p13 }
 0x121   : > { %p770_p9 = pneg %p769_p7 }
 0x123   : > { %p775_p3 = pnand %p774_p2, %p770_p9 }
 0x125   : > { %778 = shalt.err (!%p775_p3)
}
 0x126   : > { %420 = dma.vmem_to_hbm [thread:$0]  (%p1004_p6), %s416_s6, %s562_s0, %s418_s30, %s395_s17  }
 0x127 PF: > { %s429_s10 = sand.u32 1, %s810_s12   ;;  %p1063_p8 = scmp.ge.s32.totalorder %s822_s15, 2 }
 0x128   : > { %s430_s9 = scalar_lea.sflag [#allocation4], %s429_s10 }
 0x129   : > { %p592_p4 = pnand %p1063_p8, %p938_p12 }
 0x12b   : > { %p593_p10 = pneg %p592_p4 }
 0x12d   : > { %805 = dma.done.wait (%p593_p10), %s430_s9, 64  }
 0x12e   : > { %807 = vsyncadd (%p593_p10), %s430_s9, 4294967232  ;;  %p17_p11 = scmp.ge.s32.totalorder %s870_s16, 4   ;;  %s1064_s12 = smov %s814_s13 }
 0x12f   : > { %s1065_s13 = smov %s818_s14  ;;  %s1066_s14 = smov %s881_s19 }
 0x130   : > { %s1067_s15 = smov %s870_s16  ;;  %19 = sbr.rel (!%p17_p11) target bundleno = 8 (0x8), region = 93 }
 0x135   :  { %436 = vsyncpa [#allocation3], 1 }
 0x136   :  { %438 = vsyncpa [#allocation3 + $0x1], 1 }
 0x137   :  { %439 = vsyncpa [#allocation6], 1 }
 0x138   :  { %441 = vsyncpa [#allocation6 + $0x1], 1 }
 0x139   :  { %442 = vsyncpa [#allocation4], 1 }
 0x13a   :  { %444 = vsyncpa [#allocation4 + $0x1], 1 }

</bundles_post_ra>
